<compile_context>
chip_gen: v7x
topology: tpu7x:2x2x1
jax: 0.10.0
libtpu: 0.0.40
codegen_flags: <defaults>
</compile_context>

<pallas_src>
import math

import jax
import jax.numpy as jnp
from jax.experimental import pallas as pl
from jax.experimental.pallas import tpu as pltpu


def _stable_audio_pos_emb_kernel(times_ref, w2pi_ref, out_ref):
    # times_ref: (tb, 1)              batch tile on sublanes (lane-padded input)
    # w2pi_ref:  (1, half_dim)        weights pre-scaled by 2*pi
    # out_ref:   (tb, 1 + 2*half_dim) final layout [t | sin | cos]
    t = times_ref[...]                      # (tb, 1)
    w = w2pi_ref[...]                       # (1, half_dim)
    half_dim = w.shape[-1]

    freqs = t * w                           # (tb, half_dim), VPU broadcast mul

    # Times column: data already in VMEM, 1-wide masked store is ~free.
    out_ref[:, 0:1] = t
    # sin/cos slabs (VALU polynomial work). Offset-by-1 lane layout is required
    # to match the PyTorch [t | sin | cos] column order exactly.
    out_ref[:, 1:1 + half_dim] = jnp.sin(freqs)
    out_ref[:, 1 + half_dim:] = jnp.cos(freqs)


def stable_audio_positional_embedding(
    times: jax.Array,
    weights: jax.Array,
    *,
    tile_b: int = 1024,
    min_split_b: int = 1024,
) -> jax.Array:
    """times: (B,) float, weights: (half_dim,) float -> (B, 1 + 2*half_dim) f32."""
    assert times.ndim == 1
    assert weights.ndim == 1
    B = times.shape[0]
    half_dim = weights.shape[0]
    d_out = 1 + 2 * half_dim

    t = times.astype(jnp.float32)
    # Fold 2*pi into the weights once (tiny one-off op outside the kernel).
    w2pi = (weights.astype(jnp.float32) * jnp.float32(2.0 * math.pi)).reshape(
        1, half_dim
    )

    # Balanced, sublane-aligned (multiple-of-8) batch tiling.
    n_tiles = max(1, -(-B // tile_b))                  # cdiv(B, tile_b)
    if B >= min_split_b and n_tiles < 2:
        # Ensure >=2 grid steps so the "parallel" axis can shard across the
        # two TensorCores on v7x; tiny B keeps grid=(1,) to avoid overhead.
        n_tiles = 2
    tb = -(-B // n_tiles)                              # cdiv(B, n_tiles)
    tb = ((tb + 7) // 8) * 8                           # sublane-align
    Bp = n_tiles * tb                                  # padding waste < 8*n_tiles rows

    t_pad = jnp.pad(t, (0, Bp - B)) if Bp != B else t
    # NOTE: a (tb, 1) f32 block lane-pads to (tb, 128) in VMEM; at tb<=2048 this
    # is <~1 MiB per buffer, acceptable even on v7x's smaller VMEM.
    t2d = t_pad.reshape(Bp, 1)

    out = pl.pallas_call(
        _stable_audio_pos_emb_kernel,
        out_shape=jax.ShapeDtypeStruct((Bp, d_out), jnp.float32),
        grid=(n_tiles,),
        in_specs=[
            pl.BlockSpec((tb, 1), lambda i: (i, 0)),         # times tile
            pl.BlockSpec((1, half_dim), lambda i: (0, 0)),   # shared weights
        ],
        out_specs=pl.BlockSpec((tb, d_out), lambda i: (i, 0)),
        compiler_params=pltpu.CompilerParams(
            dimension_semantics=("parallel",)
        ),
    )(t2d, w2pi)

    return out[:B]


def _reference(times, weights):
    t = times[..., None].astype(jnp.float32)
    freqs = t * weights[None].astype(jnp.float32) * (2.0 * math.pi)
    fouriered = jnp.concatenate([jnp.sin(freqs), jnp.cos(freqs)], axis=-1)
    return jnp.concatenate([t, fouriered], axis=-1)


if __name__ == "__main__":
    key = jax.random.PRNGKey(0)
    k_t, k_w = jax.random.split(key)

    dim = 32                     # module hidden dim (must be even)
    half_dim = dim // 2
    B = 8                        # batch of continuous times

    # Deterministic "parameter" init (mimics torch.randn(half_dim)).
    weights = jax.random.normal(k_w, (half_dim,), dtype=jnp.float32)
    # Example continuous times in [0, 1).
    times = jax.random.uniform(k_t, (B,), dtype=jnp.float32)

    out = stable_audio_positional_embedding(times, weights)
    out = jax.block_until_ready(out)

    ref = _reference(times, weights)
    assert out.shape == (B, 1 + dim), out.shape
    assert jnp.allclose(out, ref, atol=1e-5, rtol=1e-5), float(
        jnp.max(jnp.abs(out - ref))
    )

    # Also exercise an uneven, larger batch to cover the balanced-tiling and
    # multi-tile (parallel grid) paths.
    B2 = 1030
    times2 = jax.random.uniform(jax.random.PRNGKey(1), (B2,), dtype=jnp.float32)
    out2 = jax.block_until_ready(
        stable_audio_positional_embedding(times2, weights)
    )
    ref2 = _reference(times2, weights)
    assert out2.shape == (B2, 1 + dim), out2.shape
    assert jnp.allclose(out2, ref2, atol=1e-5, rtol=1e-5), float(
        jnp.max(jnp.abs(out2 - ref2))
    )

    print("KERNEL_OK")
</pallas_src>

<mosaic_0001>
module attributes {stable_mosaic.version = 11 : i64} {
  func.func @_stable_audio_pos_emb_kernel(%arg0: i32, %arg1: memref<8x1xf32, #tpu.memory_space<vmem>>, %arg2: memref<1x16xf32, #tpu.memory_space<vmem>>, %arg3: memref<8x33xf32, #tpu.memory_space<vmem>>) attributes {dimension_semantics = [#tpu.dimension_semantics<parallel>], iteration_bounds = array<i64: 1>, scalar_prefetch = 0 : i64, scratch_operands = 0 : i64, tpu.core_type = #tpu.core_type<tc>, window_params = [{transform_indices = @transform_0, window_bounds = array<i64: 8, 1>}, {pipeline_mode = #tpu.pipeline_mode<synchronous>, transform_indices = @transform_1, window_bounds = array<i64: 1, 16>}, {transform_indices = @transform_2, window_bounds = array<i64: 8, 33>}]} {
    %c0 = arith.constant 0 : index
    %c0_0 = arith.constant 0 : index
    %0 = vector.load %arg1[%c0, %c0_0] : memref<8x1xf32, #tpu.memory_space<vmem>>, vector<8x1xf32>
    %c0_1 = arith.constant 0 : index
    %c0_2 = arith.constant 0 : index
    %1 = vector.load %arg2[%c0_1, %c0_2] : memref<1x16xf32, #tpu.memory_space<vmem>>, vector<1x16xf32>
    %2 = vector.broadcast %0 : vector<8x1xf32> to vector<8x16xf32>
    %3 = vector.broadcast %1 : vector<1x16xf32> to vector<8x16xf32>
    %4 = arith.mulf %2, %3 : vector<8x16xf32>
    %c0_3 = arith.constant 0 : index
    %c0_4 = arith.constant 0 : index
    %5 = vector.load %arg3[%c0_3, %c0_4] : memref<8x33xf32, #tpu.memory_space<vmem>>, vector<8x1xf32>
    tpu.vector_store %arg3[%c0_3, %c0_4], %0 {strides = array<i32>} : memref<8x33xf32, #tpu.memory_space<vmem>>, vector<8x1xf32>,
    %6 = math.sin %4 : vector<8x16xf32>
    %c0_5 = arith.constant 0 : index
    %c1 = arith.constant 1 : index
    %7 = vector.load %arg3[%c0_5, %c1] : memref<8x33xf32, #tpu.memory_space<vmem>>, vector<8x16xf32>
    tpu.vector_store %arg3[%c0_5, %c1], %6 {strides = array<i32>} : memref<8x33xf32, #tpu.memory_space<vmem>>, vector<8x16xf32>,
    %8 = math.cos %4 : vector<8x16xf32>
    %c0_6 = arith.constant 0 : index
    %c17 = arith.constant 17 : index
    %9 = vector.load %arg3[%c0_6, %c17] : memref<8x33xf32, #tpu.memory_space<vmem>>, vector<8x16xf32>
    tpu.vector_store %arg3[%c0_6, %c17], %8 {strides = array<i32>} : memref<8x33xf32, #tpu.memory_space<vmem>>, vector<8x16xf32>,
    return
  }
  func.func @transform_0(%arg0: i32) -> (i32, i32) {
    %c0_i32 = arith.constant 0 : i32
    %c0_i32_0 = arith.constant 0 : i32
    return %arg0, %c0_i32 : i32, i32
  }
  func.func @transform_1(%arg0: i32) -> (i32, i32) {
    %c0_i32 = arith.constant 0 : i32
    %c0_i32_0 = arith.constant 0 : i32
    %c0_i32_1 = arith.constant 0 : i32
    return %c0_i32, %c0_i32_0 : i32, i32
  }
  func.func @transform_2(%arg0: i32) -> (i32, i32) {
    %c0_i32 = arith.constant 0 : i32
    %c0_i32_0 = arith.constant 0 : i32
    return %arg0, %c0_i32 : i32, i32
  }
}

</mosaic_0001>

<bundles_post_ra>
// kernel: tpu_custom_call.1
= control target key start
LH: loop header
LB: loop body
LE: loop exit
PB: predicated region body
PF: predicated region fallthrough
CT: control target
= control target key end

     0   :  { %vm26_vm0 = vcmask 7168   ;;  %v313_v1 = vmov 0   ;;  %s377_s0 = inlined_call_operand.vmem [shape: f32[8,1], index: 0, kind: input, shape index: {}]   ;;  %s378_s1 = inlined_call_operand.vmem [shape: f32[1,16], index: 1, kind: input, shape index: {}]   ;;  %s379_s2 = inlined_call_operand.hbm [shape: f32[8,33], index: 2, kind: output, shape index: {}]  }
   0x1   :  { %v12_v0 = vld [vmem:[%s377_s0] sm:$0xff]  ;;  %284 = vset.pattern.permute.xlu0 %v313_v1 }
   0x2   :  { %27 = vst.msk [vmem:[#allocation2] sm:$0xff] %vm26_vm0, %v12_v0  ;;  %16 = vperm.xlu0 %284, %v12_v0  }
   0x3   :  { %7 = vsyncpa [#allocation3], 0  ;;  %v261_v2 = vld [vmem:[%s378_s1] ss:$0 sm:$0xff]  ;;  %v314_v16 = vmov 2102212464  }
   0x4   :  { %v315_v18 = vmov 920167782   ;;  %v316_v22 = vmov 1326507024   ;;  %v317_v24 = vmov 683565275  }
   0x5   :  { %v318_v26 = vmov 2475754826   ;;  %v319_v29 = vmov 2131351028   ;;  %s320_s0 = smov 17   ;;  %s321_s1 = smov 1  }
   0x6   :  { %s322_s13 = smov [#allocation2]  }
   0x7   :  { %s253_s14 = sshll.u32 %s322_s13, 4  ;;  %s254_s14 = int_to_ptr.vmem [resolvable:$true] %s253_s14 }
   0x8   :  { %s289_s15 = scalar_lea.vmem %s254_s14, 128  ;;  %p294_p1 = scmp.lt.s32.totalorder %s254_s14, %s254_s14 }
   0x9   :  { %p290_p0 = scmp.ne.s32.totalorder %s254_s14, %s289_s15  ;;  %p295_p2 = scmp.lt.s32.totalorder %s289_s15, %s289_s15 }
   0xb   :  { %p296_p3 = por %p295_p2, %p294_p1 }
   0xd   :  { %p297_p4 = pnand %p296_p3, %p290_p0 }
  0x81   :  { %v17_v3 = vpop.permute.xlu0 %16 }
  0x82   :  { %v344_v4 = vmul.f32 %v261_v2, %v17_v3 }
  0x84   :  { %v31_v5 = vand.u32 2139095040, %v344_v4  ;;  %v28_v6 = vand.u32 2147483647, %v344_v4  ;;  %vm30_vm8 = vcmp.lt.s32.totalorder %v344_v4, 0  ;;  %vm120_vm0 = vweird.f32 %v344_v4 }
  0x86   :  { %v32_v7 = vshrl.u32 %v31_v5, 23  ;;  %v35_v9 = vand.u32 8388607, %v28_v6  ;;  %vm29_vm9 = vcmp.le.f32.partialorder %v28_v6, 0.7853982 }
  0x88   :  { %v262_v8 = vadd.s32 4294967169, %v32_v7  ;;  %v36_v12 = vor.u32 8388608, %v35_v9 }
  0x8a   :  { %v38_v10 = vadd.s32 1, %v262_v8  ;;  %v76_v20 = vshll.u32 %v36_v12, 8 }
  0x8c   :  { %vm39_vm1 = vcmp.gt.s32.totalorder %v38_v10, 0 }
  0x8d   :  { %v40_v11 = vsel %vm39_vm1, %v38_v10, 0  ;;  %vm136_vm1 = vcmask 138248  }
  0x8e   :  { %v42_v13 = vand.u32 31, %v40_v11  ;;  %v41_v14 = vshrl.u32 %v40_v11, 5 }
  0x90   :  { %v43_v15 = vsub.s32 32, %v42_v13  ;;  %v54_v17 = vshll.u32 %v314_v16, %v42_v13  ;;  %v57_v19 = vshll.u32 %v315_v18, %v42_v13  ;;  %v45_v25 = vshll.u32 %v317_v24, %v42_v13 }
  0x91   :  { %v48_v28 = vshll.u32 %v318_v26, %v42_v13  ;;  %v51_v31 = vshll.u32 %v319_v29, %v42_v13  ;;  %vm63_vm2 = vcmp.lt.s32.totalorder %v41_v14, 4  ;;  %vm60_vm3 = vcmp.lt.s32.totalorder %v41_v14, 1 }
  0x92   :  { %v55_v21 = vshrl.u32 %v315_v18, %v43_v15  ;;  %v58_v23 = vshrl.u32 %v316_v22, %v43_v15  ;;  %v46_v27 = vshrl.u32 %v318_v26, %v43_v15  ;;  %v49_v30 = vshrl.u32 %v319_v29, %v43_v15 }
  0x93   :  { %v52_v32 = vshrl.u32 %v314_v16, %v43_v15  ;;  %v44_v36 = vshrl.u32 %v317_v24, %v43_v15  ;;  %vm61_vm4 = vcmp.lt.s32.totalorder %v41_v14, 2  ;;  %vm62_vm5 = vcmp.lt.s32.totalorder %v41_v14, 3 }
  0x94   :  { %v56_v33 = vor.u32 %v55_v21, %v54_v17  ;;  %v59_v34 = vor.u32 %v58_v23, %v57_v19  ;;  %v47_v35 = vor.u32 %v46_v27, %v45_v25  ;;  %v50_v37 = vor.u32 %v49_v30, %v48_v28 }
  0x95   :  { %v53_v38 = vor.u32 %v52_v32, %v51_v31 }
  0x96   :  { %v69_v39 = vsel %vm63_vm2, %v56_v33, 920167782  ;;  %v73_v40 = vsel %vm63_vm2, %v59_v34, 1326507024  ;;  %v68_v42 = vsel %vm60_vm3, %v47_v35, %v50_v37  ;;  %v64_v45 = vsel %vm60_vm3, %v44_v36, %v47_v35 }
  0x97   :  { %v65_v41 = vsel %vm63_vm2, %v53_v38, 2102212464  ;;  %v70_v43 = vsel %vm62_vm5, %v53_v38, %v69_v39  ;;  %v72_v44 = vsel %vm60_vm3, %v50_v37, %v53_v38  ;;  %v74_v48 = vsel %vm62_vm5, %v56_v33, %v73_v40 }
  0x98   :  { %v66_v46 = vsel %vm62_vm5, %v50_v37, %v65_v41  ;;  %v71_v47 = vsel %vm61_vm4, %v68_v42, %v70_v43  ;;  %v75_v49 = vsel %vm61_vm4, %v72_v44, %v74_v48  ;;  %vm245_vm2 = vcmask 269448  }
  0x99   :  { %v350_v50 = vmul.u32.u64.low %v76_v20, %v71_v47  ;;  %v351_v51 = vmul.u32.u64.high %v76_v20, %v71_v47, %v350_v50  ;;  %v353_v52 = vmul.u32.u64.low %v76_v20, %v75_v49  ;;  %v354_v53 = vmul.u32.u64.high %v76_v20, %v75_v49, %v353_v52 }
  0x9a   :  { %v67_v54 = vsel %vm61_vm4, %v64_v45, %v66_v46 }
  0x9b   :  { %v86_v55 = vadd.s32 1, %v351_v51  ;;  %v83_v56 = vmul.u32 %v76_v20, %v67_v54  ;;  %vm85_vm6 = vc.u32 %v354_v53, %v350_v50  ;;  %v84_v5 = vadd.s32 %v350_v50, %v354_v53 }
  0x9d   :  { %v87_v57 = vsel %vm85_vm6, %v86_v55, %v351_v51 }
  0x9e   :  { %v88_v58 = vadd.s32 %v87_v57, %v83_v56 }
  0xa0   :  { %v89_v59 = vadd.s32 536870912, %v88_v58 }
  0xa2   :  { %v90_v60 = vshrl.u32 %v89_v59, 30 }
  0xa4   :  { %v91_v61 = vshll.u32 %v90_v60, 30  ;;  %v114_v18 = vsub.s32 4, %v90_v60 }
  0xa6   :  { %v92_v62 = vsub.s32 %v88_v58, %v91_v61  ;;  %v115_v21 = vsel %vm30_vm8, %v114_v18, %v90_v60 }
  0xa7   :  { %v117_v23 = vsel %vm29_vm9, 0, %v115_v21 }
  0xa8   :  { %v94_v63 = vsub.s32 0, %v92_v62  ;;  %v121_v24 = vadd.s32 3, %v117_v23  ;;  %v231_v25 = vand.u32 3, %v117_v23 }
  0xaa   :  { %v263_v0 = vmin.u32 %v94_v63, %v92_v62  ;;  %v122_v26 = vand.u32 3, %v121_v24  ;;  %vm236_vm10 = vcmp.eq.s32.totalorder %v231_v25, 2  ;;  %vm233_vm12 = vcmp.eq.s32.totalorder %v231_v25, 0 }
  0xab   :  { %vm232_vm14 = vcmp.lt.s32.totalorder %v231_v25, 2 }
  0xac   :  { %v96_v1 = vclz %v263_v0  ;;  %vm127_vm11 = vcmp.eq.s32.totalorder %v122_v26, 2  ;;  %vm124_vm13 = vcmp.eq.s32.totalorder %v122_v26, 0  ;;  %vm123_vm15 = vcmp.lt.s32.totalorder %v122_v26, 2 }
  0xae   :  { %v264_v2 = vadd.s32 4294967294, %v96_v1 }
  0xb0   :  { %vm265_vm7 = vcmp.lt.s32.totalorder %v264_v2, 0 }
  0xb1   :  { %v99_v3 = vsel %vm265_vm7, 0, %v264_v2 }
  0xb2   :  { %v100_v7 = vsub.s32 32, %v99_v3  ;;  %v104_v8 = vsub.s32 4294967266, %v99_v3  ;;  %v101_v9 = vshll.u32 %v92_v62, %v99_v3 }
  0xb4   :  { %v102_v10 = vshrl.u32 %v84_v5, %v100_v7  ;;  %v105_v11 = vadd.s32 127, %v104_v8 }
  0xb6   :  { %v103_v12 = vor.u32 %v102_v10, %v101_v9  ;;  %v106_v13 = vshll.u32 %v105_v11, 23 }
  0xb8   :  { %v107_v14 = vor.u32 4788187, %v106_v13  ;;  %v110_v16 = vcvt.s32.f32 %v103_v12 }
  0xba   :  { %v108_v15 = vand.u32 2147483647, %v107_v14 }
  0xbc   :  { %v111_v17 = vmul.f32 %v110_v16, %v108_v15 }
  0xbe   :  { %v112_v19 = vxor.u32 2147483648, %v111_v17 }
  0xc0   :  { %v113_v20 = vsel %vm30_vm8, %v112_v19, %v111_v17 }
  0xc1   :  { %v116_v22 = vsel %vm29_vm9, %v344_v4, %v113_v20 }
  0xc2   :  { %285 = vcosq.f32 %v116_v22 }
  0xc3   :  { %287 = vsinq.f32 %v116_v22 }
  0xcc   :  { %v286_v27 = vpop.eup %285 }
  0xcd   :  { %v288_v28 = vpop.eup %287  ;;  %v128_v29 = vxor.u32 2147483648, %v286_v27 }
  0xce   :  { %v125_v30 = vxor.u32 2147483648, %v288_v28 }
  0xcf   :  { %v238_v31 = vsel %vm236_vm10, %v128_v29, %v288_v28  ;;  %v129_v6 = vsel %vm127_vm11, %v128_v29, %v288_v28 }
  0xd0   :  { %v235_v32 = vsel %vm233_vm12, %v286_v27, %v125_v30  ;;  %v126_v33 = vsel %vm124_vm13, %v286_v27, %v125_v30 }
  0xd1   :  { %v239_v34 = vsel %vm232_vm14, %v235_v32, %v238_v31  ;;  %v130_v35 = vsel %vm123_vm15, %v126_v33, %v129_v6 }
  0xd2   :  { %v240_v36 = vsel %vm120_vm0, nan, %v239_v34  ;;  %v131_v37 = vsel %vm120_vm0, nan, %v130_v35 }
  0xd3   :  { %242 = vrot.lane.b32.xlu1 %v240_v36, %s320_s0  ;;  %133 = vrot.lane.b32.xlu0 %v131_v37, %s321_s1 }
 0x145   :  { %v243_v38 = vpop.permute.xlu1 %242  ;;  %v134_v39 = vpop.permute.xlu0 %133 }
 0x146   :  { %137 = vst.msk [vmem:[#allocation2] sm:$0xff] %vm136_vm1, %v134_v39 }
 0x147   :  { %246 = vst.msk [vmem:[#allocation2] sm:$0xff] %vm245_vm2, %v243_v38 }
 0x148   :  { %300 = shalt.err (!%p297_p4)
}
 0x149   :  { %s301_s18 = scalar_lea.hbm %s379_s2, 128 }
 0x14a   :  { %p302_p5 = scmp.ne.s32.totalorder %s379_s2, %s301_s18  ;;  %p305_p6 = scmp.lt.u32.totalorder %s301_s18, %s379_s2 }
 0x14c   :  { %p307_p7 = pnand %p305_p6, %p302_p5 }
 0x14e   :  { %310 = shalt.err (!%p307_p7)
}
 0x14f   :  { %256 = dma.vmem_to_hbm [thread:$0]  %s254_s14, 128, %s379_s2, [#allocation3]  }
 0x150   :  { %311 = dma.done.wait [#allocation3], 128  }
 0x151   :  { %312 = vsyncadd [#allocation3], 4294967168 }
 0x152   :  { %260 = vsyncpa [#allocation3], 1 }

</bundles_post_ra>
